<compile_context>
chip_gen: v7x
topology: tpu7x:2x2x1
jax: 0.10.0
libtpu: 0.0.40
codegen_flags: <defaults>
</compile_context>

<pallas_src>
import functools

import jax
import jax.numpy as jnp
from jax import lax
from jax.experimental import pallas as pl
from jax.experimental.pallas import tpu as pltpu


# --------------------------------------------------------------------------
# Kernel
# --------------------------------------------------------------------------
def _attn_kernel(xq_ref, xk_ref, xv_ref, wq_ref, wk_ref, wv_ref, wo_ref,
                 out_ref, k_cache, v_cache, o_scratch,
                 *, heads, proj_chunk, exp_dtype):
    """One (batch n, q-tile t) grid step: full multi-head attention for the tile."""
    t = pl.program_id(1)
    E = wq_ref.shape[1]
    d = E // heads
    Lk = k_cache.shape[0]
    Lv = v_cache.shape[0]

    # ---- K/V projections: compute once per batch element (t == 0), reuse after.
    # Chunked along the sequence axis so the f32 MXU results never exceed
    # O(proj_chunk * E) live VMEM before the bf16 downcast into the caches.
    @pl.when(t == 0)
    def _():
        for s in range(0, Lk, proj_chunk):
            c = min(proj_chunk, Lk - s)
            k_cache[s:s + c, :] = jnp.dot(
                xk_ref[0, s:s + c, :], wk_ref[...],
                preferred_element_type=jnp.float32).astype(jnp.bfloat16)
        for s in range(0, Lv, proj_chunk):
            c = min(proj_chunk, Lv - s)
            v_cache[s:s + c, :] = jnp.dot(
                xv_ref[0, s:s + c, :], wv_ref[...],
                preferred_element_type=jnp.float32).astype(jnp.bfloat16)

    # ---- Q projection for this tile (1/sqrt(E) scale folded into Wq on host).
    q = jnp.dot(xq_ref[0], wq_ref[...],
                preferred_element_type=jnp.float32).astype(jnp.bfloat16)   # (tq, E)

    k = k_cache[...]   # (Lk, E) bf16, cached
    v = v_cache[...]   # (Lv, E) bf16, cached

    for h in range(heads):  # heads is a small static compile-time constant
        sl = slice(h * d, (h + 1) * d)
        qh, kh, vh = q[:, sl], k[:, sl], v[:, sl]

        # energy = qh @ kh^T, contracting last dims directly (no transpose).
        energy = lax.dot_general(
            qh, kh, dimension_numbers=(((1,), (1,)), ((), ())),
            preferred_element_type=jnp.float32)                    # (tq, Lk) f32

        # Numerically-stable softmax; exp in exp_dtype (bf16 on v6e/v7x),
        # row-sum accumulated back in f32.
        m = jnp.max(energy, axis=-1, keepdims=True)
        p = jnp.exp((energy - m).astype(exp_dtype))
        row_sum = jnp.sum(p.astype(jnp.float32), axis=-1, keepdims=True)

        # Unnormalized AV matmul, then DEFERRED normalization on (tq, d):
        # mathematically identical, Lk/d fewer VPU multiplies.
        oh = jnp.dot(p.astype(jnp.bfloat16), vh,
                     preferred_element_type=jnp.float32)           # (tq, d) f32
        oh = oh * pl.reciprocal(row_sum, approx=True)

        # Write head result at its lane offset (no tail concatenate).
        o_scratch[:, sl] = oh.astype(jnp.bfloat16)

    # Single full-width fc_out matmul + single store of the output tile.
    out = jnp.dot(o_scratch[...], wo_ref[...], preferred_element_type=jnp.float32)
    out_ref[0] = out.astype(out_ref.dtype)


# --------------------------------------------------------------------------
# Host-side helpers: generation-aware tiling / VMEM budget
# --------------------------------------------------------------------------
def _physical_vmem_bytes():
    try:
        return int(pltpu.get_tpu_info().vmem_capacity_bytes)
    except Exception:
        pass
    try:
        kind = jax.devices()[0].device_kind.lower()
        if "v7" in kind:
            return 64 * 1024 * 1024
    except Exception:
        pass
    return 128 * 1024 * 1024


def _bf16_exp_ok():
    """bf16 EUP exists on v6e/v7x; keep f32 exp elsewhere (v5e has no bf16 EUP)."""
    try:
        kind = jax.devices()[0].device_kind.lower()
        return ("v6" in kind) or ("v7" in kind)
    except Exception:
        return False


def _footprint_bytes(tq, Lk, Lv, E, proj_chunk):
    """Estimated per-step VMEM footprint for the chosen tiling."""
    bf, f32 = 2, 4
    blocks = (2 * tq * E * bf              # q input tile (double-buffered)
              + 2 * (Lk + Lv) * E * bf     # xk / xv blocks (double-buffered)
              + 2 * 4 * E * E * bf         # four bf16 weights (double-buffered)
              + 2 * tq * E * f32)          # f32 output tile (double-buffered)
    scratch = (Lk + Lv) * E * bf + tq * E * bf   # K/V caches + per-head out scratch
    transient = (tq * E * f32               # q f32 before downcast
                 + proj_chunk * E * f32     # chunked projection result
                 + 2 * tq * Lk * f32        # energy + exp temporaries
                 + tq * E * f32)            # fc_out f32 result
    return blocks + scratch + transient


def _pick_q_tile(Lq, target, fits):
    """Largest multiple-of-16 divisor of Lq <= target that fits the budget; else Lq."""
    cands = [t for t in range(16 * (min(target, Lq) // 16), 0, -16) if Lq % t == 0]
    if not cands:
        cands = [Lq]          # Lq < 16 or no 16-multiple divisor: single full tile
    for t in cands:
        if fits(t):
            return t
    return cands[-1]


# --------------------------------------------------------------------------
# Wrapper
# --------------------------------------------------------------------------
def self_attention_pallas(values, keys, queries, w_v, w_k, w_q, w_o, heads,
                          *, q_tile=512):
    """values/keys/queries: (N, L, E).  w_*: (E, E) in PyTorch (out, in) layout."""
    N, Lv, E = values.shape
    Lk = keys.shape[1]
    Lq = queries.shape[1]
    d = E // heads
    assert d * heads == E

    scale = 1.0 / (float(E) ** 0.5)

    # nn.Linear(x) = x @ W.T (no bias).  Pre-transpose to (in, out), fold the
    # 1/sqrt(E) scale into Wq, and pre-cast everything to bf16 on the host.
    wq_t = (w_q.T * scale).astype(jnp.bfloat16)
    wk_t = w_k.T.astype(jnp.bfloat16)
    wv_t = w_v.T.astype(jnp.bfloat16)
    wo_t = w_o.T.astype(jnp.bfloat16)

    xq = queries.astype(jnp.bfloat16)
    xk = keys.astype(jnp.bfloat16)
    xv = values.astype(jnp.bfloat16)

    proj_chunk = Lk if Lk <= 512 else 512

    physical = _physical_vmem_bytes()
    budget = int(physical * 0.75)          # ~96 MiB on v5e/v6e, ~48 MiB on v7x
    fits = lambda t: _footprint_bytes(t, Lk, Lv, E, proj_chunk) <= budget

    tq = _pick_q_tile(Lq, q_tile, fits)
    n_qt = Lq // tq

    fp = _footprint_bytes(tq, Lk, Lv, E, proj_chunk)
    vmem_limit = min(max(int(1.25 * fp), 32 * 1024 * 1024), budget)

    kernel = functools.partial(
        _attn_kernel, heads=heads, proj_chunk=proj_chunk,
        exp_dtype=jnp.bfloat16 if _bf16_exp_ok() else jnp.float32)

    w_spec = pl.BlockSpec((E, E), lambda n, t: (0, 0))

    return pl.pallas_call(
        kernel,
        out_shape=jax.ShapeDtypeStruct((N, Lq, E), jnp.float32),
        grid_spec=pltpu.PrefetchScalarGridSpec(
            num_scalar_prefetch=0,
            grid=(N, n_qt),
            in_specs=[
                pl.BlockSpec((1, tq, E), lambda n, t: (n, t, 0)),   # queries tile
                pl.BlockSpec((1, Lk, E), lambda n, t: (n, 0, 0)),   # keys (full)
                pl.BlockSpec((1, Lv, E), lambda n, t: (n, 0, 0)),   # values (full)
                w_spec,  # Wq^T * scale
                w_spec,  # Wk^T
                w_spec,  # Wv^T
                w_spec,  # Wo^T
            ],
            out_specs=pl.BlockSpec((1, tq, E), lambda n, t: (n, t, 0)),
            scratch_shapes=[
                pltpu.VMEM((Lk, E), jnp.bfloat16),   # projected K cache
                pltpu.VMEM((Lv, E), jnp.bfloat16),   # projected V cache
                pltpu.VMEM((tq, E), jnp.bfloat16),   # per-head output scratch
            ],
        ),
        compiler_params=pltpu.CompilerParams(
            # t must be "arbitrary": the K/V scratch caches are filled at t == 0
            # and reused across the whole q-tile sweep of each batch element.
            dimension_semantics=("parallel", "arbitrary"),
            vmem_limit_bytes=vmem_limit),
    )(xq, xk, xv, wq_t, wk_t, wv_t, wo_t)


# --------------------------------------------------------------------------
# Pure-JAX reference (mirrors the PyTorch forward; mask is a no-op there)
# --------------------------------------------------------------------------
def self_attention_ref(values, keys, queries, w_v, w_k, w_q, w_o, heads):
    N, Lq, E = queries.shape
    Lv, Lk = values.shape[1], keys.shape[1]
    d = E // heads
    v = (values @ w_v.T).reshape(N, Lv, heads, d)
    k = (keys @ w_k.T).reshape(N, Lk, heads, d)
    q = (queries @ w_q.T).reshape(N, Lq, heads, d)
    energy = jnp.einsum('nqhd,nkhd->nhqk', q, k)
    attn = jax.nn.softmax(energy / (E ** 0.5), axis=3)
    out = jnp.einsum('nhql,nlhd->nqhd', attn, v).reshape(N, Lq, E)
    return out @ w_o.T


if __name__ == "__main__":
    # Small shapes consistent with the module: batch=2, seq=8, embedding=32, heads=4
    N, L, E, H = 2, 8, 32, 4

    key = jax.random.PRNGKey(0)
    kv, kk, kq, kwv, kwk, kwq, kwo = jax.random.split(key, 7)

    values = jax.random.normal(kv, (N, L, E), dtype=jnp.float32)
    keys = jax.random.normal(kk, (N, L, E), dtype=jnp.float32)
    queries = jax.random.normal(kq, (N, L, E), dtype=jnp.float32)

    # Deterministic weight init matching nn.Linear's default U(-1/sqrt(E), 1/sqrt(E)).
    bound = 1.0 / (E ** 0.5)
    init = lambda k: jax.random.uniform(k, (E, E), jnp.float32, -bound, bound)
    w_v, w_k, w_q, w_o = init(kwv), init(kwk), init(kwq), init(kwo)

    out = self_attention_pallas(values, keys, queries, w_v, w_k, w_q, w_o, H)
    out = jax.block_until_ready(out)

    ref = self_attention_ref(values, keys, queries, w_v, w_k, w_q, w_o, H)
    assert out.shape == (N, L, E)
    # bf16 MXU operands + bf16 exp (v6e/v7x) + approx reciprocal, with f32
    # accumulation throughout -> looser tolerance than a pure-f32 kernel; this
    # is an intentional perf/accuracy trade.
    max_err = float(jnp.max(jnp.abs(out - ref)))
    assert max_err < 5e-2, max_err

    print("KERNEL_OK")
</pallas_src>

<mosaic_0001>
module attributes {stable_mosaic.version = 11 : i64} {
  func.func @_attn_kernel(%arg0: i32, %arg1: i32, %arg2: memref<1x8x32xbf16, #tpu.memory_space<vmem>>, %arg3: memref<1x8x32xbf16, #tpu.memory_space<vmem>>, %arg4: memref<1x8x32xbf16, #tpu.memory_space<vmem>>, %arg5: memref<32x32xbf16, #tpu.memory_space<vmem>>, %arg6: memref<32x32xbf16, #tpu.memory_space<vmem>>, %arg7: memref<32x32xbf16, #tpu.memory_space<vmem>>, %arg8: memref<32x32xbf16, #tpu.memory_space<vmem>>, %arg9: memref<1x8x32xf32, #tpu.memory_space<vmem>>, %arg10: memref<8x32xbf16, #tpu.memory_space<vmem>>, %arg11: memref<8x32xbf16, #tpu.memory_space<vmem>>, %arg12: memref<8x32xbf16, #tpu.memory_space<vmem>>) attributes {dimension_semantics = [#tpu.dimension_semantics<parallel>, #tpu.dimension_semantics<arbitrary>], iteration_bounds = array<i64: 2, 1>, scalar_prefetch = 0 : i64, scratch_operands = 3 : i64, tpu.core_type = #tpu.core_type<tc>, window_params = [{transform_indices = @transform_0, window_bounds = array<i64: 1, 8, 32>}, {transform_indices = @transform_1, window_bounds = array<i64: 1, 8, 32>}, {transform_indices = @transform_2, window_bounds = array<i64: 1, 8, 32>}, {pipeline_mode = #tpu.pipeline_mode<synchronous>, transform_indices = @transform_3, window_bounds = array<i64: 32, 32>}, {pipeline_mode = #tpu.pipeline_mode<synchronous>, transform_indices = @transform_4, window_bounds = array<i64: 32, 32>}, {pipeline_mode = #tpu.pipeline_mode<synchronous>, transform_indices = @transform_5, window_bounds = array<i64: 32, 32>}, {pipeline_mode = #tpu.pipeline_mode<synchronous>, transform_indices = @transform_6, window_bounds = array<i64: 32, 32>}, {transform_indices = @transform_7, window_bounds = array<i64: 1, 8, 32>}]} {
    %c0_i32 = arith.constant 0 : i32
    %0 = arith.cmpi eq, %arg1, %c0_i32 : i32
    %1 = arith.extui %0 : i1 to i32
    %c0_i32_0 = arith.constant 0 : i32
    %2 = arith.cmpi ne, %1, %c0_i32_0 : i32
    scf.if %2 {
      %c0_38 = arith.constant 0 : index
      %c0_39 = arith.constant 0 : index
      %c0_40 = arith.constant 0 : index
      %88 = vector.load %arg3[%c0_38, %c0_39, %c0_40] : memref<1x8x32xbf16, #tpu.memory_space<vmem>>, vector<1x8x32xbf16>
      %89 = vector.shape_cast %88 : vector<1x8x32xbf16> to vector<8x32xbf16>
      %c0_41 = arith.constant 0 : index
      %c0_42 = arith.constant 0 : index
      %90 = vector.load %arg6[%c0_41, %c0_42] : memref<32x32xbf16, #tpu.memory_space<vmem>>, vector<32x32xbf16>
      %cst_43 = arith.constant dense<0.000000e+00> : vector<8x32xf32>
      %91 = tpu.matmul %89, %90, %cst_43 {dimension_numbers = #tpu.dot_dimension_numbers<[1], [0], [0], [1], [0, 0, 1, 1], [], []>} : vector<8x32xbf16>, vector<32x32xbf16>, vector<8x32xf32> -> vector<8x32xf32>
      %92 = arith.truncf %91 : vector<8x32xf32> to vector<8x32xbf16>
      %c0_44 = arith.constant 0 : index
      %c0_45 = arith.constant 0 : index
      %93 = vector.load %arg10[%c0_44, %c0_45] : memref<8x32xbf16, #tpu.memory_space<vmem>>, vector<8x32xbf16>
      tpu.vector_store %arg10[%c0_44, %c0_45], %92 {strides = array<i32>} : memref<8x32xbf16, #tpu.memory_space<vmem>>, vector<8x32xbf16>,
      %c0_46 = arith.constant 0 : index
      %c0_47 = arith.constant 0 : index
      %c0_48 = arith.constant 0 : index
      %94 = vector.load %arg4[%c0_46, %c0_47, %c0_48] : memref<1x8x32xbf16, #tpu.memory_space<vmem>>, vector<1x8x32xbf16>
      %95 = vector.shape_cast %94 : vector<1x8x32xbf16> to vector<8x32xbf16>
      %c0_49 = arith.constant 0 : index
      %c0_50 = arith.constant 0 : index
      %96 = vector.load %arg7[%c0_49, %c0_50] : memref<32x32xbf16, #tpu.memory_space<vmem>>, vector<32x32xbf16>
      %cst_51 = arith.constant dense<0.000000e+00> : vector<8x32xf32>
      %97 = tpu.matmul %95, %96, %cst_51 {dimension_numbers = #tpu.dot_dimension_numbers<[1], [0], [0], [1], [0, 0, 1, 1], [], []>} : vector<8x32xbf16>, vector<32x32xbf16>, vector<8x32xf32> -> vector<8x32xf32>
      %98 = arith.truncf %97 : vector<8x32xf32> to vector<8x32xbf16>
      %c0_52 = arith.constant 0 : index
      %c0_53 = arith.constant 0 : index
      %99 = vector.load %arg11[%c0_52, %c0_53] : memref<8x32xbf16, #tpu.memory_space<vmem>>, vector<8x32xbf16>
      tpu.vector_store %arg11[%c0_52, %c0_53], %98 {strides = array<i32>} : memref<8x32xbf16, #tpu.memory_space<vmem>>, vector<8x32xbf16>,
    } else {
    }
    %c0 = arith.constant 0 : index
    %c0_1 = arith.constant 0 : index
    %c0_2 = arith.constant 0 : index
    %3 = vector.load %arg2[%c0, %c0_1, %c0_2] : memref<1x8x32xbf16, #tpu.memory_space<vmem>>, vector<1x8x32xbf16>
    %4 = vector.shape_cast %3 : vector<1x8x32xbf16> to vector<8x32xbf16>
    %c0_3 = arith.constant 0 : index
    %c0_4 = arith.constant 0 : index
    %5 = vector.load %arg5[%c0_3, %c0_4] : memref<32x32xbf16, #tpu.memory_space<vmem>>, vector<32x32xbf16>
    %cst = arith.constant dense<0.000000e+00> : vector<8x32xf32>
    %6 = tpu.matmul %4, %5, %cst {dimension_numbers = #tpu.dot_dimension_numbers<[1], [0], [0], [1], [0, 0, 1, 1], [], []>} : vector<8x32xbf16>, vector<32x32xbf16>, vector<8x32xf32> -> vector<8x32xf32>
    %7 = arith.truncf %6 : vector<8x32xf32> to vector<8x32xbf16>
    %c0_5 = arith.constant 0 : index
    %c0_6 = arith.constant 0 : index
    %8 = vector.load %arg10[%c0_5, %c0_6] : memref<8x32xbf16, #tpu.memory_space<vmem>>, vector<8x32xbf16>
    %c0_7 = arith.constant 0 : index
    %c0_8 = arith.constant 0 : index
    %9 = vector.load %arg11[%c0_7, %c0_8] : memref<8x32xbf16, #tpu.memory_space<vmem>>, vector<8x32xbf16>
    %10 = vector.extract_strided_slice %7 {offsets = [0, 0], sizes = [8, 8], strides = [1, 1]} : vector<8x32xbf16> to vector<8x8xbf16>
    %11 = vector.extract_strided_slice %8 {offsets = [0, 0], sizes = [8, 8], strides = [1, 1]} : vector<8x32xbf16> to vector<8x8xbf16>
    %12 = vector.extract_strided_slice %9 {offsets = [0, 0], sizes = [8, 8], strides = [1, 1]} : vector<8x32xbf16> to vector<8x8xbf16>
    %cst_9 = arith.constant dense<0.000000e+00> : vector<8x8xf32>
    %13 = tpu.matmul %10, %11, %cst_9 {dimension_numbers = #tpu.dot_dimension_numbers<[1], [1], [0], [0], [0, 0, 1, 0], [], []>} : vector<8x8xbf16>, vector<8x8xbf16>, vector<8x8xf32> -> vector<8x8xf32>
    %cst_10 = arith.constant dense<0xFF800000> : vector<8xf32>
    %14 = vector.multi_reduction <maximumf>, %13, %cst_10 [1] : vector<8x8xf32> to vector<8xf32>
    %15 = vector.shape_cast %14 : vector<8xf32> to vector<8x1xf32>
    %16 = vector.broadcast %15 : vector<8x1xf32> to vector<8x8xf32>
    %17 = arith.subf %13, %16 : vector<8x8xf32>
    %18 = math.exp %17 : vector<8x8xf32>
    %cst_11 = arith.constant dense<0.000000e+00> : vector<8xf32>
    %19 = vector.multi_reduction <add>, %18, %cst_11 [1] : vector<8x8xf32> to vector<8xf32>
    %20 = vector.shape_cast %19 : vector<8xf32> to vector<8x1xf32>
    %21 = arith.truncf %18 : vector<8x8xf32> to vector<8x8xbf16>
    %cst_12 = arith.constant dense<0.000000e+00> : vector<8x8xf32>
    %22 = tpu.matmul %21, %12, %cst_12 {dimension_numbers = #tpu.dot_dimension_numbers<[1], [0], [0], [1], [0, 0, 1, 1], [], []>} : vector<8x8xbf16>, vector<8x8xbf16>, vector<8x8xf32> -> vector<8x8xf32>
    %23 = tpu.reciprocal %20 {approx = true} : vector<8x1xf32> -> vector<8x1xf32>
    %24 = vector.broadcast %23 : vector<8x1xf32> to vector<8x8xf32>
    %25 = arith.mulf %22, %24 : vector<8x8xf32>
    %26 = arith.truncf %25 : vector<8x8xf32> to vector<8x8xbf16>
    %c0_13 = arith.constant 0 : index
    %c0_14 = arith.constant 0 : index
    %27 = vector.load %arg12[%c0_13, %c0_14] : memref<8x32xbf16, #tpu.memory_space<vmem>>, vector<8x8xbf16>
    tpu.vector_store %arg12[%c0_13, %c0_14], %26 {strides = array<i32>} : memref<8x32xbf16, #tpu.memory_space<vmem>>, vector<8x8xbf16>,
    %28 = vector.extract_strided_slice %7 {offsets = [0, 8], sizes = [8, 8], strides = [1, 1]} : vector<8x32xbf16> to vector<8x8xbf16>
    %29 = vector.extract_strided_slice %8 {offsets = [0, 8], sizes = [8, 8], strides = [1, 1]} : vector<8x32xbf16> to vector<8x8xbf16>
    %30 = vector.extract_strided_slice %9 {offsets = [0, 8], sizes = [8, 8], strides = [1, 1]} : vector<8x32xbf16> to vector<8x8xbf16>
    %cst_15 = arith.constant dense<0.000000e+00> : vector<8x8xf32>
    %31 = tpu.matmul %28, %29, %cst_15 {dimension_numbers = #tpu.dot_dimension_numbers<[1], [1], [0], [0], [0, 0, 1, 0], [], []>} : vector<8x8xbf16>, vector<8x8xbf16>, vector<8x8xf32> -> vector<8x8xf32>
    %cst_16 = arith.constant dense<0xFF800000> : vector<8xf32>
    %32 = vector.multi_reduction <maximumf>, %31, %cst_16 [1] : vector<8x8xf32> to vector<8xf32>
    %33 = vector.shape_cast %32 : vector<8xf32> to vector<8x1xf32>
    %34 = vector.broadcast %33 : vector<8x1xf32> to vector<8x8xf32>
    %35 = arith.subf %31, %34 : vector<8x8xf32>
    %36 = math.exp %35 : vector<8x8xf32>
    %cst_17 = arith.constant dense<0.000000e+00> : vector<8xf32>
    %37 = vector.multi_reduction <add>, %36, %cst_17 [1] : vector<8x8xf32> to vector<8xf32>
    %38 = vector.shape_cast %37 : vector<8xf32> to vector<8x1xf32>
    %39 = arith.truncf %36 : vector<8x8xf32> to vector<8x8xbf16>
    %cst_18 = arith.constant dense<0.000000e+00> : vector<8x8xf32>
    %40 = tpu.matmul %39, %30, %cst_18 {dimension_numbers = #tpu.dot_dimension_numbers<[1], [0], [0], [1], [0, 0, 1, 1], [], []>} : vector<8x8xbf16>, vector<8x8xbf16>, vector<8x8xf32> -> vector<8x8xf32>
    %41 = tpu.reciprocal %38 {approx = true} : vector<8x1xf32> -> vector<8x1xf32>
    %42 = vector.broadcast %41 : vector<8x1xf32> to vector<8x8xf32>
    %43 = arith.mulf %40, %42 : vector<8x8xf32>
    %44 = arith.truncf %43 : vector<8x8xf32> to vector<8x8xbf16>
    %c0_19 = arith.constant 0 : index
    %c8 = arith.constant 8 : index
    %45 = vector.load %arg12[%c0_19, %c8] : memref<8x32xbf16, #tpu.memory_space<vmem>>, vector<8x8xbf16>
    tpu.vector_store %arg12[%c0_19, %c8], %44 {strides = array<i32>} : memref<8x32xbf16, #tpu.memory_space<vmem>>, vector<8x8xbf16>,
    %46 = vector.extract_strided_slice %7 {offsets = [0, 16], sizes = [8, 8], strides = [1, 1]} : vector<8x32xbf16> to vector<8x8xbf16>
    %47 = vector.extract_strided_slice %8 {offsets = [0, 16], sizes = [8, 8], strides = [1, 1]} : vector<8x32xbf16> to vector<8x8xbf16>
    %48 = vector.extract_strided_slice %9 {offsets = [0, 16], sizes = [8, 8], strides = [1, 1]} : vector<8x32xbf16> to vector<8x8xbf16>
    %cst_20 = arith.constant dense<0.000000e+00> : vector<8x8xf32>
    %49 = tpu.matmul %46, %47, %cst_20 {dimension_numbers = #tpu.dot_dimension_numbers<[1], [1], [0], [0], [0, 0, 1, 0], [], []>} : vector<8x8xbf16>, vector<8x8xbf16>, vector<8x8xf32> -> vector<8x8xf32>
    %cst_21 = arith.constant dense<0xFF800000> : vector<8xf32>
    %50 = vector.multi_reduction <maximumf>, %49, %cst_21 [1] : vector<8x8xf32> to vector<8xf32>
    %51 = vector.shape_cast %50 : vector<8xf32> to vector<8x1xf32>
    %52 = vector.broadcast %51 : vector<8x1xf32> to vector<8x8xf32>
    %53 = arith.subf %49, %52 : vector<8x8xf32>
    %54 = math.exp %53 : vector<8x8xf32>
    %cst_22 = arith.constant dense<0.000000e+00> : vector<8xf32>
    %55 = vector.multi_reduction <add>, %54, %cst_22 [1] : vector<8x8xf32> to vector<8xf32>
    %56 = vector.shape_cast %55 : vector<8xf32> to vector<8x1xf32>
    %57 = arith.truncf %54 : vector<8x8xf32> to vector<8x8xbf16>
    %cst_23 = arith.constant dense<0.000000e+00> : vector<8x8xf32>
    %58 = tpu.matmul %57, %48, %cst_23 {dimension_numbers = #tpu.dot_dimension_numbers<[1], [0], [0], [1], [0, 0, 1, 1], [], []>} : vector<8x8xbf16>, vector<8x8xbf16>, vector<8x8xf32> -> vector<8x8xf32>
    %59 = tpu.reciprocal %56 {approx = true} : vector<8x1xf32> -> vector<8x1xf32>
    %60 = vector.broadcast %59 : vector<8x1xf32> to vector<8x8xf32>
    %61 = arith.mulf %58, %60 : vector<8x8xf32>
    %62 = arith.truncf %61 : vector<8x8xf32> to vector<8x8xbf16>
    %c0_24 = arith.constant 0 : index
    %c16 = arith.constant 16 : index
    %63 = vector.load %arg12[%c0_24, %c16] : memref<8x32xbf16, #tpu.memory_space<vmem>>, vector<8x8xbf16>
    tpu.vector_store %arg12[%c0_24, %c16], %62 {strides = array<i32>} : memref<8x32xbf16, #tpu.memory_space<vmem>>, vector<8x8xbf16>,
    %64 = vector.extract_strided_slice %7 {offsets = [0, 24], sizes = [8, 8], strides = [1, 1]} : vector<8x32xbf16> to vector<8x8xbf16>
    %65 = vector.extract_strided_slice %8 {offsets = [0, 24], sizes = [8, 8], strides = [1, 1]} : vector<8x32xbf16> to vector<8x8xbf16>
    %66 = vector.extract_strided_slice %9 {offsets = [0, 24], sizes = [8, 8], strides = [1, 1]} : vector<8x32xbf16> to vector<8x8xbf16>
    %cst_25 = arith.constant dense<0.000000e+00> : vector<8x8xf32>
    %67 = tpu.matmul %64, %65, %cst_25 {dimension_numbers = #tpu.dot_dimension_numbers<[1], [1], [0], [0], [0, 0, 1, 0], [], []>} : vector<8x8xbf16>, vector<8x8xbf16>, vector<8x8xf32> -> vector<8x8xf32>
    %cst_26 = arith.constant dense<0xFF800000> : vector<8xf32>
    %68 = vector.multi_reduction <maximumf>, %67, %cst_26 [1] : vector<8x8xf32> to vector<8xf32>
    %69 = vector.shape_cast %68 : vector<8xf32> to vector<8x1xf32>
    %70 = vector.broadcast %69 : vector<8x1xf32> to vector<8x8xf32>
    %71 = arith.subf %67, %70 : vector<8x8xf32>
    %72 = math.exp %71 : vector<8x8xf32>
    %cst_27 = arith.constant dense<0.000000e+00> : vector<8xf32>
    %73 = vector.multi_reduction <add>, %72, %cst_27 [1] : vector<8x8xf32> to vector<8xf32>
    %74 = vector.shape_cast %73 : vector<8xf32> to vector<8x1xf32>
    %75 = arith.truncf %72 : vector<8x8xf32> to vector<8x8xbf16>
    %cst_28 = arith.constant dense<0.000000e+00> : vector<8x8xf32>
    %76 = tpu.matmul %75, %66, %cst_28 {dimension_numbers = #tpu.dot_dimension_numbers<[1], [0], [0], [1], [0, 0, 1, 1], [], []>} : vector<8x8xbf16>, vector<8x8xbf16>, vector<8x8xf32> -> vector<8x8xf32>
    %77 = tpu.reciprocal %74 {approx = true} : vector<8x1xf32> -> vector<8x1xf32>
    %78 = vector.broadcast %77 : vector<8x1xf32> to vector<8x8xf32>
    %79 = arith.mulf %76, %78 : vector<8x8xf32>
    %80 = arith.truncf %79 : vector<8x8xf32> to vector<8x8xbf16>
    %c0_29 = arith.constant 0 : index
    %c24 = arith.constant 24 : index
    %81 = vector.load %arg12[%c0_29, %c24] : memref<8x32xbf16, #tpu.memory_space<vmem>>, vector<8x8xbf16>
    tpu.vector_store %arg12[%c0_29, %c24], %80 {strides = array<i32>} : memref<8x32xbf16, #tpu.memory_space<vmem>>, vector<8x8xbf16>,
    %c0_30 = arith.constant 0 : index
    %c0_31 = arith.constant 0 : index
    %82 = vector.load %arg12[%c0_30, %c0_31] : memref<8x32xbf16, #tpu.memory_space<vmem>>, vector<8x32xbf16>
    %c0_32 = arith.constant 0 : index
    %c0_33 = arith.constant 0 : index
    %83 = vector.load %arg8[%c0_32, %c0_33] : memref<32x32xbf16, #tpu.memory_space<vmem>>, vector<32x32xbf16>
    %cst_34 = arith.constant dense<0.000000e+00> : vector<8x32xf32>
    %84 = tpu.matmul %82, %83, %cst_34 {dimension_numbers = #tpu.dot_dimension_numbers<[1], [0], [0], [1], [0, 0, 1, 1], [], []>} : vector<8x32xbf16>, vector<32x32xbf16>, vector<8x32xf32> -> vector<8x32xf32>
    %c0_35 = arith.constant 0 : index
    %c0_36 = arith.constant 0 : index
    %c0_37 = arith.constant 0 : index
    %85 = vector.load %arg9[%c0_35, %c0_36, %c0_37] : memref<1x8x32xf32, #tpu.memory_space<vmem>>, vector<1x8x32xf32>
    %86 = vector.shape_cast %85 : vector<1x8x32xf32> to vector<8x32xf32>
    %87 = vector.shape_cast %84 : vector<8x32xf32> to vector<1x8x32xf32>
    tpu.vector_store %arg9[%c0_35, %c0_36, %c0_37], %87 {strides = array<i32>} : memref<1x8x32xf32, #tpu.memory_space<vmem>>, vector<1x8x32xf32>,
    return
  }
  func.func @transform_0(%arg0: i32, %arg1: i32) -> (i32, i32, i32) {
    %c0_i32 = arith.constant 0 : i32
    %c0_i32_0 = arith.constant 0 : i32
    return %arg0, %arg1, %c0_i32 : i32, i32, i32
  }
  func.func @transform_1(%arg0: i32, %arg1: i32) -> (i32, i32, i32) {
    %c0_i32 = arith.constant 0 : i32
    %c0_i32_0 = arith.constant 0 : i32
    %c0_i32_1 = arith.constant 0 : i32
    return %arg0, %c0_i32, %c0_i32_0 : i32, i32, i32
  }
  func.func @transform_2(%arg0: i32, %arg1: i32) -> (i32, i32, i32) {
    %c0_i32 = arith.constant 0 : i32
    %c0_i32_0 = arith.constant 0 : i32
    %c0_i32_1 = arith.constant 0 : i32
    return %arg0, %c0_i32, %c0_i32_0 : i32, i32, i32
  }
  func.func @transform_3(%arg0: i32, %arg1: i32) -> (i32, i32) {
    %c0_i32 = arith.constant 0 : i32
    %c0_i32_0 = arith.constant 0 : i32
    %c0_i32_1 = arith.constant 0 : i32
    return %c0_i32, %c0_i32_0 : i32, i32
  }
  func.func @transform_4(%arg0: i32, %arg1: i32) -> (i32, i32) {
    %c0_i32 = arith.constant 0 : i32
    %c0_i32_0 = arith.constant 0 : i32
    %c0_i32_1 = arith.constant 0 : i32
    return %c0_i32, %c0_i32_0 : i32, i32
  }
  func.func @transform_5(%arg0: i32, %arg1: i32) -> (i32, i32) {
    %c0_i32 = arith.constant 0 : i32
    %c0_i32_0 = arith.constant 0 : i32
    %c0_i32_1 = arith.constant 0 : i32
    return %c0_i32, %c0_i32_0 : i32, i32
  }
  func.func @transform_6(%arg0: i32, %arg1: i32) -> (i32, i32) {
    %c0_i32 = arith.constant 0 : i32
    %c0_i32_0 = arith.constant 0 : i32
    %c0_i32_1 = arith.constant 0 : i32
    return %c0_i32, %c0_i32_0 : i32, i32
  }
  func.func @transform_7(%arg0: i32, %arg1: i32) -> (i32, i32, i32) {
    %c0_i32 = arith.constant 0 : i32
    %c0_i32_0 = arith.constant 0 : i32
    return %arg0, %arg1, %c0_i32 : i32, i32, i32
  }
}

</mosaic_0001>

<bundles_post_ra>
// kernel: tpu_custom_call.1
= control target key start
LH: loop header
LB: loop body
LE: loop exit
PB: predicated region body
PF: predicated region fallthrough
CT: control target
= control target key end

     0   :  { %s2379_s0 = inlined_call_operand.hbm [shape: bf16[2,8,32], index: 0, kind: input, shape index: {}]   ;;  %s2380_s1 = inlined_call_operand.hbm [shape: bf16[2,8,32], index: 1, kind: input, shape index: {}]   ;;  %s2381_s2 = inlined_call_operand.hbm [shape: bf16[2,8,32], index: 2, kind: input, shape index: {}]   ;;  %s2382_s3 = inlined_call_operand.hbm [shape: bf16[32,32], index: 3, kind: input, shape index: {}]   ;;  %s2383_s4 = inlined_call_operand.hbm [shape: bf16[32,32], index: 4, kind: input, shape index: {}]   ;;  %s2384_s5 = inlined_call_operand.vmem [shape: bf16[32,32], index: 5, kind: input, shape index: {}]   ;;  %s2385_s6 = inlined_call_operand.hbm [shape: bf16[32,32], index: 6, kind: input, shape index: {}]   ;;  %s2386_s7 = inlined_call_operand.hbm [shape: f32[2,8,32], index: 7, kind: output, shape index: {}]  }
   0x1   :  { %2413 = sst [smem:[#allocation30_spill]] %s2380_s1 }
   0x2   :  { %2414 = sst [smem:[#allocation31_spill]] %s2382_s3 }
   0x3   :  { %2415 = sst [smem:[#allocation32_spill]] %s2386_s7 }
   0x4   :  { %12 = vsyncpa [#allocation6], 0 }
   0x5   :  { %14 = vsyncpa [#allocation6 + $0x1], 0 }
   0x6   :  { %15 = vsyncpa [#allocation9], 0 }
   0x7   :  { %17 = vsyncpa [#allocation9 + $0x1], 0 }
   0x8   :  { %18 = vsyncpa [#allocation12], 0 }
   0x9   :  { %19 = vsyncpa [#allocation15], 0 }
   0xa   :  { %20 = vsyncpa [#allocation7], 0 }
   0xb   :  { %22 = vsyncpa [#allocation7 + $0x1], 0  ;;  %s1949_s24 = smov 0   ;;  %s1951_s25 = smov 0  }
   0xc   :  { %s1953_s26 = smov 0   ;;  %s1955_s27 = smov 0  }
   0xd   :  { %s1957_s28 = smov 0   ;;  %s1959_s29 = smov 0  }
   0xe LB: > { %2416 = sst [smem:[#allocation22_spill]] %s1870_s24  ;;  %s1980_s30 = sadd.s32 4294967295, %s1890_s29   ;;  %s1890_s29 = sphi %s1959_s29, %s28_s29   ;;  %s1886_s28 = sphi %s1957_s28, %s2460_s28   ;;  %s1882_s27 = sphi %s1955_s27, %s2459_s27   ;;  %s1878_s26 = sphi %s1953_s26, %s2463_s26   ;;  %s1874_s25 = sphi %s1951_s25, %s2462_s25   ;;  %s1870_s24 = sphi %s1949_s24, %s2461_s24  }
   0xf   : > { %2417 = sst [smem:[#allocation23_spill]] %s1882_s27  ;;  %s1323_s8 = sadd.s32 4294967294, %s1890_s29  }
  0x10   : > { %2418 = sst [smem:[#allocation24_spill]] %s1886_s28  ;;  %p62_p0 = scmp.ne.s32.totalorder %s1874_s25, %s1870_s24 }
  0x11   : > { %2419 = sst [smem:[#allocation25_spill]] %s1890_s29  ;;  %p2387_p1 = scmp.eq.s32.totalorder %s1980_s30, 0 }
  0x12   : > { %p230_p3 = scmp.eq.s32.totalorder %s1323_s8, 1  ;;  %p1324_p5 = scmp.ge.s32.totalorder %s1890_s29, 1 }
  0x13   : > { %p1989_p4 = por %p2387_p1, %p62_p0  ;;  %p237_p7 = scmp.lt.s32.totalorder %s1890_s29, 3 }
  0x14   : > { %p1994_p6 = por %p230_p3, %p62_p0  ;;  %s1892_s12 = smov [#allocation11]  }
  0x15   : > { %s2420_s9 = scalar_select %p1989_p4, 1, 0 }
  0x16   : > { %s2421_s10 = scalar_select %p1994_p6, 1, 0 }
  0x17   : > { %p1999_p8 = pnand %p1324_p5, %p237_p7  ;;  %s249_s13 = sshll.u32 %s1892_s12, 4  ;;  %s250_s13 = int_to_ptr.vmem [resolvable:$true] %s249_s13 }
  0x18   : > { %2422 = sst [smem:[#allocation26_spill]] %s2421_s10  ;;  %s40_s15 = sadd.s32 1, %s1886_s28 }
  0x19   : > { %s2423_s11 = scalar_select %p1999_p8, 1, 0 }
  0x1a   : > { %p1503_p9 = pneg %p1999_p8  ;;  %s2425_s3 = sld [smem:[#allocation31_spill]] }
  0x1c   : > { %p2008_p11 = pnand %p1503_p9, %p2387_p1 }
  0x1e   : > { %s2424_s14 = scalar_select %p2008_p11, 1, 0 }
  0x1f   : > { %p2021_p13 = pneg %p2008_p11 }
  0x20   : > { %s1622_s18 = scalar_lea.hbm %s2425_s3, 256 }
  0x21   : > { %p1623_p12 = scmp.ne.s32.totalorder %s2425_s3, %s1622_s18  ;;  %p1629_p5 = scmp.lt.u32.totalorder %s1622_s18, %s2425_s3 }
  0x22   : > { %s2426_s21 = scalar_select %p2021_p13, 1, 0 }
  0x23   : > { %p1625_p0 = pnand %p2021_p13, %p1623_p12 }
  0x25   : > { %p1626_p3 = pneg %p1625_p0 }
  0x27   : > { %p1631_p7 = pnand %p1629_p5, %p1626_p3 }
  0x29   : > { %1634 = shalt.err (!%p1631_p7)
}
  0x2a   : > { %s1635_s8 = scalar_lea.vmem %s250_s13, 256  ;;  %p1643_p2 = scmp.lt.s32.totalorder %s250_s13, %s250_s13 }
  0x2b   : > { %p1636_p9 = scmp.ne.s32.totalorder %s250_s13, %s1635_s8  ;;  %p1644_p6 = scmp.lt.s32.totalorder %s1635_s8, %s1635_s8 }
  0x2d   : > { %p1638_p10 = pnand %p1636_p9, %p2021_p13  ;;  %p1645_p4 = por %p1644_p6, %p1643_p2 }
  0x2f   : > { %p1639_p1 = pneg %p1638_p10 }
  0x31   : > { %p1646_p8 = pnand %p1645_p4, %p1639_p1 }
  0x33   : > { %1649 = shalt.err (!%p1646_p8)
}
  0x34   : > { %s2390_s12 = smov 64   ;;  %s2392_s16 = smov 4  }
  0x35   : > { %1506 = dma.hbm_to_vmem [thread:$0]  (!%p2008_p11), %s2425_s3, 256, %s250_s13, [#allocation12], %s2390_s12, %s2390_s12, %s2392_s16  }
  0x36   : > { %p42_p1 = scmp.ge.s32.totalorder %s40_s15, 2  ;;  %s49_s19 = sadd.s32 1, %s1878_s26 }
  0x37   : > { %p56_p2 = scmp.ne.s32.totalorder %s1878_s26, %s1874_s25  ;;  %p57_p4 = scmp.eq.s32.totalorder %s1890_s29, 0 }
  0x38   : > { %s2465_s15 = smov (%p42_p1, %s40_s15), 0  ;;  %p2428_p8 = scmp.eq.s32.totalorder %s1980_s30, 1 }
  0x39   : > { %2427 = sst [smem:[#allocation27_spill]] %s2465_s15  ;;  %p58_p6 = por %p57_p4, %p56_p2 }
  0x3a   : > { %p2048_p10 = por %p2428_p8, %p56_p2  ;;  %s44_s22 = ssub.s32 %s1886_s28, %s2465_s15 }
  0x3b   : > { %p1530_p12 = scmp.lt.s32.totalorder %s1890_s29, 2  ;;  %p47_p0 = scmp.eq.s32.totalorder %s44_s22, 0 }
  0x3c   : > { %s2429_s20 = scalar_select %p2048_p10, 1, 0 }
  0x3d   : > { %s2394_s23 = sand.u32 1, %s1878_s26   ;;  %s2061_s8 = sshll.u32 %s1886_s28, 6 }
  0x3e   : > { %2430 = sst [smem:[#allocation28_spill]] %s2429_s20  ;;  %s2058_s13 = sshll.u32 %s2394_s23, 2 }
  0x3f   : > { %s2064_s17 = scalar_select %p47_p0, %s1878_s26, %s49_s19  }
  0x40   : > { %p2066_p3 = pnand %p1530_p12, %p58_p6  ;;  %s311_s12 = sand.u32 1, %s1890_s29  }
  0x41   : > { %2431 = sst [smem:[#allocation29_spill]] %s2064_s17  ;;  %s2433_s1 = sld [smem:[#allocation30_spill]] }
  0x42   : > { %s2432_s18 = scalar_select %p2066_p3, 1, 0 }
  0x43   : > { %s315_s23 = scalar_lea.vmem [#allocation8], %s2058_s13  ;;  %s1895_s19 = smov [#allocation13]  }
  0x44   : > { %s322_s15 = sshll.u32 %s315_s23, 4  ;;  %s2080_s28 = sshll.u32 %s1895_s19, 4  ;;  %s2078_s15 = int_to_ptr.vmem [resolvable:$true] %s322_s15  ;;  %s263_s28 = int_to_ptr.vmem [resolvable:$true] %s2080_s28 }
  0x45   : > { %s2082_s17 = scalar_lea.sflag [#allocation9], %s311_s12  ;;  %p2088_p7 = pneg %p2066_p3 }
  0x47   : > { %s2075_s22 = scalar_lea.hbm %s2433_s1, %s2061_s8  ;;  %s1655_s29 = scalar_lea.hbm %s2433_s1, 128 }
  0x48   : > { %s1650_s10 = scalar_lea.hbm %s2075_s22, 64  ;;  %p1656_p2 = scmp.lt.u32.totalorder %s2075_s22, %s2433_s1 }
  0x49   : > { %p1651_p5 = scmp.ne.s32.totalorder %s2075_s22, %s1650_s10  ;;  %p1657_p4 = scmp.lt.u32.totalorder %s1655_s29, %s1650_s10 }
  0x4a   : > { %s2434_s3 = scalar_select %p2088_p7, 1, 0 }
  0x4b   : > { %p1653_p9 = pnand %p2088_p7, %p1651_p5  ;;  %p1658_p6 = por %p1657_p4, %p1656_p2 }
  0x4c   : > { %p1659_p8 = scmp.lt.u32.totalorder %s1650_s10, %s2075_s22 }
  0x4d   : > { %p1654_p1 = pneg %p1653_p9 }
  0x4e   : > { %p1660_p12 = por %p1659_p8, %p1658_p6 }
  0x50   : > { %p1661_p0 = pnand %p1660_p12, %p1654_p1 }
  0x52   : > { %1664 = shalt.err (!%p1661_p0)
}
  0x53   : > { %s1665_s12 = scalar_lea.vmem %s2078_s15, 64  ;;  %s1896_s16 = smov [#allocation8]  }
  0x54   : > { %p1666_p5 = scmp.ne.s32.totalorder %s2078_s15, %s1665_s12  ;;  %s1670_s23 = sshll.u32 %s1896_s16, 4  ;;  %s1671_s23 = int_to_ptr.vmem [resolvable:$false] %s1670_s23 }
  0x55   : > { %s1672_s24 = scalar_lea.vmem %s1671_s23, 128  ;;  %p1673_p11 = scmp.lt.s32.totalorder %s2078_s15, %s1671_s23 }
  0x56   : > { %p1668_p9 = pnand %p1666_p5, %p2088_p7  ;;  %p1674_p13 = scmp.lt.s32.totalorder %s1672_s24, %s1665_s12 }
  0x58   : > { %p1669_p10 = pneg %p1668_p9  ;;  %p1675_p2 = por %p1674_p13, %p1673_p11 }
  0x5a   : > { %p1676_p4 = pnand %p1675_p2, %p1669_p10 }
  0x5c   : > { %1679 = shalt.err (!%p1676_p4)
}
  0x5d   : > { %1519 = dma.hbm_to_vmem [thread:$0]  (!%p2066_p3), %s2075_s22, 64, %s2078_s15, %s2082_s17  }
  0x5e   : > { %s1680_s19 = scalar_lea.hbm %s2383_s4, 256  ;;  %p2435_p11 = scmp.ne.s32.totalorder %s2426_s21, 0 }
  0x5f   : > { %p1681_p1 = scmp.ne.s32.totalorder %s2383_s4, %s1680_s19  ;;  %p1687_p6 = scmp.lt.u32.totalorder %s1680_s19, %s2383_s4 }
  0x61   : > { %p1683_p13 = pnand %p1681_p1, %p2435_p11 }
  0x63   : > { %p1684_p10 = pneg %p1683_p13 }
  0x65   : > { %p1689_p8 = pnand %p1687_p6, %p1684_p10 }
  0x67   : > { %1692 = shalt.err (!%p1689_p8)
}
  0x68   : > { %s1693_s24 = scalar_lea.vmem %s263_s28, 256  ;;  %p1701_p9 = scmp.lt.s32.totalorder %s263_s28, %s263_s28 }
  0x69   : > { %p1694_p12 = scmp.ne.s32.totalorder %s263_s28, %s1693_s24  ;;  %p1702_p2 = scmp.lt.s32.totalorder %s1693_s24, %s1693_s24 }
  0x6b   : > { %p1696_p0 = pnand %p1694_p12, %p2435_p11  ;;  %p1703_p4 = por %p1702_p2, %p1701_p9 }
  0x6d   : > { %p1697_p5 = pneg %p1696_p0 }
  0x6f   : > { %p1704_p3 = pnand %p1703_p4, %p1697_p5 }
  0x71   : > { %1707 = shalt.err (!%p1704_p3)
}
  0x72   : > { %p2436_p1 = scmp.ne.s32.totalorder %s2424_s14, 0  ;;  %s2437_s1 = smov 4  }
  0x73   : > { %s2438_s15 = smov 64   ;;  %s1897_s10 = smov [#allocation14]  }
  0x74   : > { %1509 = dma.hbm_to_vmem [thread:$0]  (!%p2436_p1), %s2383_s4, 256, %s263_s28, [#allocation12], %s2438_s15, %s2438_s15, %s2437_s1  }
  0x75   : > { %s278_s19 = sshll.u32 %s1897_s10, 4  ;;  %s1708_s23 = scalar_lea.hbm %s2385_s6, 256  ;;  %s279_s19 = int_to_ptr.vmem [resolvable:$true] %s278_s19 }
  0x76   : > { %p1709_p3 = scmp.ne.s32.totalorder %s2385_s6, %s1708_s23  ;;  %p1715_p6 = scmp.lt.u32.totalorder %s1708_s23, %s2385_s6 }
  0x78   : > { %p1711_p13 = pnand %p1709_p3, %p2435_p11 }
  0x7a   : > { %p1712_p10 = pneg %p1711_p13 }
  0x7c   : > { %p1717_p8 = pnand %p1715_p6, %p1712_p10 }
  0x7e   : > { %1720 = shalt.err (!%p1717_p8)
}
  0x7f   : > { %s1721_s28 = scalar_lea.vmem %s279_s19, 256  ;;  %p1729_p9 = scmp.lt.s32.totalorder %s279_s19, %s279_s19 }
  0x80   : > { %p1722_p12 = scmp.ne.s32.totalorder %s279_s19, %s1721_s28  ;;  %p1730_p2 = scmp.lt.s32.totalorder %s1721_s28, %s1721_s28 }
  0x82   : > { %p1724_p0 = pnand %p1722_p12, %p2435_p11  ;;  %p1731_p4 = por %p1730_p2, %p1729_p9 }
  0x84   : > { %p1725_p5 = pneg %p1724_p0 }
  0x86   : > { %p1732_p7 = pnand %p1731_p4, %p1725_p5 }
  0x88   : > { %1735 = shalt.err (!%p1732_p7)
}
  0x89   : > { %1512 = dma.hbm_to_vmem [thread:$0]  (!%p2436_p1), %s2385_s6, 256, %s279_s19, [#allocation15], %s2438_s15, %s2438_s15, %s2437_s1  }
  0x8a   : > { %s2159_s22 = scalar_lea.hbm %s2379_s0, %s2061_s8  ;;  %s296_s14 = scalar_lea.vmem [#allocation5], %s2058_s13 }
  0x8b   : > { %s304_s29 = sshll.u32 %s296_s14, 4  ;;  %s2439_s10 = sand.u32 1, %s1878_s26   ;;  %s305_s29 = int_to_ptr.vmem [resolvable:$true] %s304_s29 }
  0x8c   : > { %s293_s16 = scalar_lea.sflag [#allocation6], %s2439_s10  ;;  %s1736_s12 = scalar_lea.hbm %s2159_s22, 64 }
  0x8d   : > { %p1737_p7 = scmp.ne.s32.totalorder %s2159_s22, %s1736_s12  ;;  %p2440_p11 = scmp.ne.s32.totalorder %s2434_s3, 0 }
  0x8e   : > { %s1741_s19 = scalar_lea.hbm %s2379_s0, 128  ;;  %p1742_p1 = scmp.lt.u32.totalorder %s2159_s22, %s2379_s0 }
  0x8f   : > { %p1739_p3 = pnand %p1737_p7, %p2440_p11  ;;  %p1743_p10 = scmp.lt.u32.totalorder %s1741_s19, %s1736_s12 }
  0x90   : > { %p1745_p8 = scmp.lt.u32.totalorder %s1736_s12, %s2159_s22 }
  0x91   : > { %p1740_p13 = pneg %p1739_p3  ;;  %p1744_p6 = por %p1743_p10, %p1742_p1 }
  0x93   : > { %p1746_p12 = por %p1745_p8, %p1744_p6 }
  0x95   : > { %p1747_p0 = pnand %p1746_p12, %p1740_p13 }
  0x97   : > { %1750 = shalt.err (!%p1747_p0)
}
  0x98   : > { %s1751_s28 = scalar_lea.vmem %s305_s29, 64  ;;  %s1898_s7 = smov [#allocation5]  }
  0x99   : > { %p1752_p5 = scmp.ne.s32.totalorder %s305_s29, %s1751_s28  ;;  %s1756_s27 = sshll.u32 %s1898_s7, 4  ;;  %s1757_s27 = int_to_ptr.vmem [resolvable:$false] %s1756_s27 }
  0x9a   : > { %s1758_s21 = scalar_lea.vmem %s1757_s27, 128  ;;  %p1759_p4 = scmp.lt.s32.totalorder %s305_s29, %s1757_s27 }
  0x9b   : > { %p1754_p9 = pnand %p1752_p5, %p2440_p11  ;;  %p1760_p7 = scmp.lt.s32.totalorder %s1758_s21, %s1751_s28 }
  0x9d   : > { %p1755_p2 = pneg %p1754_p9  ;;  %p1761_p3 = por %p1760_p7, %p1759_p4 }
  0x9f   : > { %p1762_p1 = pnand %p1761_p3, %p1755_p2 }
  0xa1   : > { %1765 = shalt.err (!%p1762_p1)
}
  0xa2   : > { %p2441_p10 = scmp.ne.s32.totalorder %s2432_s18, 0  ;;  %s2185_s10 = scalar_lea.hbm %s2381_s2, %s2061_s8 }
  0xa3   : > { %s333_s12 = scalar_lea.vmem [#allocation10], %s2058_s13  ;;  %s1766_s15 = scalar_lea.hbm %s2185_s10, 64 }
  0xa4   : > { %1516 = dma.hbm_to_vmem [thread:$0]  (!%p2441_p10), %s2159_s22, 64, %s305_s29, %s293_s16  }
  0xa5   : > { %s340_s1 = sshll.u32 %s333_s12, 4  ;;  %p1767_p13 = scmp.ne.s32.totalorder %s2185_s10, %s1766_s15  ;;  %s341_s1 = int_to_ptr.vmem [resolvable:$true] %s340_s1 }
  0xa6   : > { %s1771_s22 = scalar_lea.hbm %s2381_s2, 128  ;;  %p1772_p12 = scmp.lt.u32.totalorder %s2185_s10, %s2381_s2 }
  0xa7   : > { %p1769_p6 = pnand %p1767_p13, %p2440_p11  ;;  %p1773_p0 = scmp.lt.u32.totalorder %s1771_s22, %s1766_s15 }
  0xa8   : > { %p1775_p9 = scmp.lt.u32.totalorder %s1766_s15, %s2185_s10 }
  0xa9   : > { %p1770_p8 = pneg %p1769_p6  ;;  %p1774_p5 = por %p1773_p0, %p1772_p12 }
  0xab   : > { %p1776_p2 = por %p1775_p9, %p1774_p5 }
  0xad   : > { %p1777_p4 = pnand %p1776_p2, %p1770_p8 }
  0xaf   : > { %1780 = shalt.err (!%p1777_p4)
}
  0xb0   : > { %s1781_s13 = scalar_lea.vmem %s341_s1, 64  ;;  %s1899_s8 = smov [#allocation10]  }
  0xb1   : > { %p1782_p7 = scmp.ne.s32.totalorder %s341_s1, %s1781_s13  ;;  %s1786_s24 = sshll.u32 %s1899_s8, 4  ;;  %s1787_s24 = int_to_ptr.vmem [resolvable:$false] %s1786_s24 }
  0xb2   : > { %s1788_s28 = scalar_lea.vmem %s1787_s24, 128  ;;  %p1789_p13 = scmp.lt.s32.totalorder %s341_s1, %s1787_s24 }
  0xb3   : > { %p1784_p3 = pnand %p1782_p7, %p2440_p11  ;;  %p1790_p6 = scmp.lt.s32.totalorder %s1788_s28, %s1781_s13 }
  0xb5   : > { %p1785_p1 = pneg %p1784_p3  ;;  %p1791_p10 = por %p1790_p6, %p1789_p13 }
  0xb7   : > { %p1792_p0 = pnand %p1791_p10, %p1785_p1 }
  0xb9   : > { %1795 = shalt.err (!%p1792_p0)
}
  0xba   : > { %p2442_p12 = scmp.ne.s32.totalorder %s2432_s18, 0  ;;  %p2443_p8 = scmp.ne.s32.totalorder %s2423_s11, 0 }
  0xbb   : > { %s2209_s3 = sand.u32 (!%p2443_p8), 1, %s1874_s25   ;;  %p2444_p11 = scmp.ne.s32.totalorder (!%p2443_p8), %s2420_s9, 0 }
  0xbc   : > { %1522 = dma.hbm_to_vmem [thread:$0]  (!%p2442_p12), %s2185_s10, 64, %s341_s1, %s2082_s17  }
  0xbd   : > { %349 = sbr.rel (%p2443_p8) target bundleno = 1518 (0x5ee), region = 48  ;;  %s2212_s7 = sshll.u32 (!%p2443_p8), %s2209_s3, 2 }
  0xbe   : > { %s352_s27 = scalar_lea.sflag (!%p2443_p8), [#allocation6], %s2209_s3  ;;  %s355_s21 = scalar_lea.vmem (!%p2443_p8), [#allocation5], %s2212_s7 }
  0xc4   : > { %1849 = dma.done.wait (%p2444_p11), %s352_s27, 64  }
  0xc5   : > { %1851 = vsyncadd (%p2444_p11), %s352_s27, 4294967232  ;;  %s360_s11 = sand.u32 1, %s1980_s30   ;;  %s364_s18 = scalar_lea.vmem [#allocation8], %s2212_s7 }
  0xc6   : > { %s361_s17 = scalar_lea.sflag [#allocation9], %s360_s11 }
  0xc7   : > { %1853 = dma.done.wait (%p2444_p11), %s361_s17, 128  }
  0xc8   : > { %1855 = vsyncadd (%p2444_p11), %s361_s17, 4294967168  ;;  %s373_s20 = scalar_lea.vmem [#allocation10], %s2212_s7  ;;  %p2445_p10 = scmp.eq.s32.totalorder %s1980_s30, 0 }
  0xca   : > { %1857 = dma.done.wait (%p2445_p10), [#allocation12], 512   ;;  %p2446_p5 = pmov %p2445_p10 }
  0xcc   : > { %1859 = vsyncadd (%p2446_p5), [#allocation12], 4294966784  ;;  %p2447_p9 = pmov %p2446_p5 }
  0xcd   : > { %p2448_p2 = pmov %p2446_p5 }
  0xce   : > { %1861 = dma.done.wait (%p2447_p9), [#allocation15], 256  }
  0xcf   : > { %1863 = vsyncadd (%p2448_p2), [#allocation15], 4294967040  ;;  %v1900_v0 = vmov 0.0   ;;  %vm1901_vm0 = vmmov 0   ;;  %v1596_v1 = vld [vmem:[#allocation13] sm:$0xff]   ;;  %v1597_v2 = vld [vmem:[#allocation13 + $0x8] sm:$0xff]  }
  0xd0   : > { %1403 = vmatprep.subr.bf16.mxu0 %v1900_v0  ;;  %1407 = vmatprep.mubr.msk.bf16.mxu0 %vm1901_vm0, %v1900_v0  ;;  %v431_v3 = vld [vmem:[%s364_s18] sm:$0xf]  ;;  %v1598_v4 = vld [vmem:[#allocation11] sm:$0xff]   ;;  %vm448_vm1 = vcmask 261120   ;;  %v1599_v6 = vld [vmem:[#allocation11 + $0x8] sm:$0xff]   ;;  %vm493_vm2 = vcmask 257024  }
  0xd1   : > { %1411 = vmatprep.subr.bf16.mxu1 %v1900_v0  ;;  %1415 = vmatprep.mubr.msk.bf16.mxu1 %vm1901_vm0, %v1900_v0  ;;  %v1600_v5 = vld [vmem:[%s2384_s5] sm:$0xff]   ;;  %v1601_v8 = vld [vmem:[%s2384_s5 + $0x8] sm:$0xff]   ;;  %vm621_vm3 = vcmask 64512   ;;  %s1902_s12 = smov 112   ;;  %s1903_s1 = smov 120   ;;  %vm681_vm4 = vcmask 1043456  }
  0xd2   : > { %1404 = vmatpush3.bf16.msra.mxu0 %v1596_v1  ;;  %1412 = vmatpush3.bf16.msra.mxu1 %v1600_v5  ;;  %v557_v7 = vld [vmem:[%s355_s21] sm:$0xf]  ;;  %v495_v9 = vld [vmem:[%s373_s20] sm:$0xf]  ;;  %s1904_s15 = smov 104   ;;  %vm728_vm5 = vcmask 60416  }
  0xd3   : > { %1405 = vmatprep.subr.bf16.mxu0 %v1900_v0  ;;  %1413 = vmatprep.subr.bf16.mxu1 %v1900_v0  ;;  %s1905_s19 = smov 8   ;;  %s1906_s23 = smov 16   ;;  %vm854_vm6 = vcmask 126016   ;;  %vm973_vm7 = vcmask 191616   ;;  %vm1092_vm8 = vcmask 257216  }
  0xd4   : > { %s2449_s22 = sld [smem:[#allocation23_spill]]  ;;  %s1907_s29 = smov 24  }
  0xd5   : > { %s2450_s16 = sld [smem:[#allocation28_spill]]  ;;  %s1342_s13 = sshll.u32 %s2209_s3, 3 }
  0xd6   : > { %1406 = vmatpush3.bf16.msra.mxu0 %v1597_v2  ;;  %1414 = vmatpush3.bf16.msra.mxu1 %v1601_v8  ;;  %s425_s24 = scalar_lea.vmem [#allocation16], %s1342_s13  ;;  %s2451_s21 = sld [smem:[#allocation32_spill]] }
  0xd7   : > { %1419 = vmatprep.subr.bf16.mxu0 %v1900_v0  ;;  %1427 = vmatprep.subr.bf16.mxu1 %v1900_v0  ;;  %s1170_s28 = sshll.u32 %s425_s24, 4  ;;  %s1156_s17 = scalar_lea.sflag [#allocation7], %s2209_s3  ;;  %s2331_s28 = int_to_ptr.vmem [resolvable:$true] %s1170_s28 }
  0xd8   : > { %s1796_s18 = scalar_lea.vmem %s2331_s28, 128  ;;  %s1908_s20 = smov [#allocation16]  }
  0xd9   : > { %1408 = vmatmul.mubr.msk.bf16.vlgmr.msra.gmra.mrb[0].mxu0 %vm448_vm1, %v431_v3  ;;  %1416 = vmatmul.mubr.msk.bf16.vlgmr.msra.gmra.mrb[0].mxu1 %vm448_vm1, %v495_v9  ;;  %p1797_p4 = scmp.ne.s32.totalorder %s2331_s28, %s1796_s18  ;;  %s1800_s30 = sshll.u32 %s1908_s20, 4  ;;  %s1801_s30 = int_to_ptr.vmem [resolvable:$false] %s1800_s30 }
  0xda   : > { %1420 = vmatpush3.bf16.msra.mxu0 %v1598_v4  ;;  %1423 = vmatprep.mubr.msk.bf16.mxu0 %vm1901_vm0, %v1900_v0  ;;  %s1369_s8 = sshll.u32 %s2449_s22, 7  ;;  %s1802_s9 = scalar_lea.vmem %s1801_s30, 256 }
  0xdb   : > { %1421 = vmatprep.subr.bf16.mxu0 %v1900_v0  ;;  %1429 = vmatprep.mubr.msk.bf16.mxu1 %vm1901_vm0, %v1900_v0  ;;  %p2452_p7 = scmp.ne.s32.totalorder %s2450_s16, 0  ;;  %p1803_p13 = scmp.lt.s32.totalorder %s2331_s28, %s1801_s30 }
  0xdc   : > { %s2329_s11 = scalar_lea.hbm %s2451_s21, %s1369_s8  ;;  %p1804_p6 = scmp.lt.s32.totalorder %s1802_s9, %s1796_s18 }
  0xdd   : > { %p1798_p3 = pnand %p1797_p4, %p2452_p7 }
  0xde   : > { %1422 = vmatpush3.bf16.msra.mxu0 %v1599_v6  ;;  %p1805_p0 = por %p1804_p6, %p1803_p13 }
  0xdf   : > { %1433 = vmatprep.subr.bf16.mxu0 %v1900_v0  ;;  %p1799_p1 = pneg %p1798_p3 }
  0xe1   : > { %1424 = vmatmul.mubr.msk.bf16.vlgmr.msra.gmra.mrb[4].mxu0 %vm448_vm1, %v557_v7  ;;  %p1806_p12 = pnand %p1805_p0, %p1799_p1 }
  0xe2   : > { %1435 = vmatprep.mubr.msk.bf16.mxu0 %vm1901_vm0, %v1900_v0 }
 0x1ac   : > { %v486_v10 = vpop.f32.mrb[0].mxu0  ;;  %v549_v23 = vpop.f32.mrb[0].mxu1 }
 0x1ad   : > { %v492_v11 = vpack.c.bf16 %v486_v10, %v486_v10  ;;  %v1409_v12 = vpop.f32.mrb[1].mxu0  ;;  %v555_v24 = vpack.c.bf16 %v549_v23, %v549_v23  ;;  %v1417_v25 = vpop.f32.mrb[1].mxu1 }
 0x1ae   : > { %v489_v13 = vpop.f32.mrb[2].mxu0  ;;  %v552_v26 = vpop.f32.mrb[2].mxu1 }
 0x1af   : > { %494 = vst.msk [vmem:[#allocation2] sm:$0xf] %vm493_vm2, %v492_v11  ;;  %v1410_v14 = vpop.f32.mrb[3].mxu0  ;;  %556 = vst.msk [vmem:[#allocation3] sm:$0xf] %vm493_vm2, %v555_v24  ;;  %v1418_v27 = vpop.f32.mrb[3].mxu1 }
 0x1b4   : > { %v612_v15 = vpop.f32.mrb[4].mxu0 }
 0x1b5   : > { %v1425_v16 = vpop.f32.mrb[5].mxu0  ;;  %v618_v22 = vpack.c.bf16 %v612_v15, %v612_v15 }
 0x1b6   : > { %v619_v17 = vld [vmem:[#allocation2] sm:$0xf]  ;;  %v615_v18 = vpop.f32.mrb[6].mxu0  ;;  %v620_v28 = vld [vmem:[#allocation3] sm:$0xf] }
 0x1b7   : > { %v626_v19 = vsel %vm621_vm3, %v619_v17, 0  ;;  %v1354_v20 = vcombine.low %v619_v17, %v619_v17  ;;  %v1426_v21 = vpop.f32.mrb[7].mxu0  ;;  %v683_v29 = vsel %vm681_vm4, %v620_v28, 0  ;;  %v1356_v57 = vcombine.low %v620_v28, %v620_v28 }
 0x1b8   : > { %1428 = vmatpush3.bf16.xpose.msra.mxu1 %v626_v19  ;;  %1434 = vmatpush3.bf16.msra.mxu0 %v683_v29 }
 0x1b9   : > { %858 = vrot.lane.b32.xlu1 %v1354_v20, %s1902_s12  ;;  %736 = vrot.lane.b32.xlu0 %v1354_v20, %s1903_s1 }
 0x1ba   : > { %1439 = vmatprep.subr.bf16.mxu1 %v1900_v0  ;;  %1445 = vmatprep.subr.bf16.mxu0 %v1900_v0 }
 0x1bd   : > { %856 = vrot.lane.b32.xlu1 %v618_v22, %s1902_s12  ;;  %731 = vrot.lane.b32.xlu0 %v618_v22, %s1903_s1 }
 0x1bf   : > { %1430 = vmatmul.mubr.msk.bf16.vlgmr.msra.gmra.mrb[4].mxu1 %vm621_vm3, %v618_v22 }
 0x1c0   : > { %1441 = vmatprep.mubr.msk.bf16.mxu1 %vm1901_vm0, %v1900_v0 }
 0x1c1   : > { %975 = vrot.lane.b32.xlu1 %v618_v22, %s1904_s15  ;;  %977 = vrot.lane.b32.xlu0 %v1354_v20, %s1904_s15 }
 0x22b   : > { %v737_v30 = vpop.permute.xlu0 %736  ;;  %v859_v32 = vpop.permute.xlu1 %858 }
 0x22c   : > { %v742_v31 = vsel %vm621_vm3, %v737_v30, 0  ;;  %v864_v34 = vsel %vm621_vm3, %v859_v32, 0 }
 0x22d   : > { %1440 = vmatpush3.bf16.xpose.msra.mxu1 %v742_v31 }
 0x22e   : > { %1451 = vmatprep.subr.bf16.mxu1 %v1900_v0 }
 0x22f   : > { %v732_v33 = vpop.permute.xlu0 %731  ;;  %v857_v36 = vpop.permute.xlu1 %856 }
 0x233   : > { %v978_v35 = vpop.permute.xlu0 %977  ;;  %v976_v38 = vpop.permute.xlu1 %975 }
 0x234   : > { %1442 = vmatmul.mubr.msk.bf16.vlgmr.msra.gmra.mrb[8].mxu1 %vm621_vm3, %v732_v33  ;;  %v983_v37 = vsel %vm621_vm3, %v978_v35, 0 }
 0x235   : > { %1452 = vmatpush3.bf16.xpose.msra.mxu1 %v864_v34  ;;  %1453 = vmatprep.mubr.msk.bf16.mxu1 %vm1901_vm0, %v1900_v0 }
 0x236   : > { %1463 = vmatprep.subr.bf16.mxu1 %v1900_v0 }
 0x23c   : > { %1454 = vmatmul.mubr.msk.bf16.vlgmr.msra.gmra.mrb[12].mxu1 %vm621_vm3, %v857_v36 }
 0x23d   : > { %1464 = vmatpush3.bf16.xpose.msra.mxu1 %v983_v37  ;;  %1465 = vmatprep.mubr.msk.bf16.mxu1 %vm1901_vm0, %v1900_v0 }
 0x23e   : > { %1475 = vmatprep.subr.bf16.mxu1 %v1900_v0 }
 0x244   : > { %1466 = vmatmul.mubr.msk.bf16.vlgmr.msra.gmra.mrb[16].mxu1 %vm621_vm3, %v976_v38 }
 0x245   : > { %1479 = vmatprep.mubr.msk.bf16.mxu1 %vm1901_vm0, %v1900_v0 }
 0x292   : > { %v662_v39 = vpop.f32.mrb[4].mxu1 }
 0x293   : > { %v1431_v40 = vpop.f32.mrb[5].mxu1  ;;  %v668_v41 = vsel %vm621_vm3, %v662_v39, -inf }
 0x294   : > { %669 = vmax.xlane.f32.xlu0 %v668_v41  ;;  %v665_v42 = vpop.f32.mrb[6].mxu1 }
 0x295   : > { %v1432_v43 = vpop.f32.mrb[7].mxu1 }
 0x307   : > { %v778_v44 = vpop.f32.mrb[8].mxu1 }
 0x308   : > { %v1443_v45 = vpop.f32.mrb[9].mxu1  ;;  %v784_v46 = vsel %vm621_vm3, %v778_v44, -inf }
 0x309   : > { %785 = vmax.xlane.f32.xlu1 %v784_v46  ;;  %v781_v47 = vpop.f32.mrb[10].mxu1 }
 0x30a   : > { %v1444_v48 = vpop.f32.mrb[11].mxu1  ;;  %v1604_v47 = vld [vmem:[#allocation14] sm:$0xff]  }
 0x30b   : > { %1476 = vmatpush3.bf16.msra.mxu1 %v1604_v47 }
 0x30c   : > { %1477 = vmatprep.subr.bf16.mxu1 %v1900_v0 }
 0x30f   : > { %v900_v49 = vpop.f32.mrb[12].mxu1 }
 0x310   : > { %v1455_v50 = vpop.f32.mrb[13].mxu1  ;;  %v906_v51 = vsel %vm621_vm3, %v900_v49, -inf }
 0x311   : > { %907 = vmax.xlane.f32.xlu0 %v906_v51  ;;  %v903_v52 = vpop.f32.mrb[14].mxu1  ;;  %v1605_v51 = vld [vmem:[#allocation14 + $0x8] sm:$0xff]  }
 0x312   : > { %v1456_v53 = vpop.f32.mrb[15].mxu1  ;;  %1478 = vmatpush3.bf16.msra.mxu1 %v1605_v51 }
 0x317   : > { %v1019_v54 = vpop.f32.mrb[16].mxu1 }
 0x318   : > { %v1467_v55 = vpop.f32.mrb[17].mxu1  ;;  %v1025_v56 = vsel %vm621_vm3, %v1019_v54, -inf }
 0x319   : > { %1026 = vmax.xlane.f32.xlu0 %v1025_v56  ;;  %v1022_v58 = vpop.f32.mrb[18].mxu1 }
 0x31a   : > { %797 = vrot.lane.b32.xlu1 %v1356_v57, %s1903_s1  ;;  %v1468_v59 = vpop.f32.mrb[19].mxu1 }
 0x31e   : > { %1035 = vrot.lane.b32.xlu1 %v1356_v57, %s1904_s15 }
 0x321   : > { %v670_v60 = vpop.xlane.xlu0 %669 }
 0x322   : > { %v671_v61 = vsub.f32 %v662_v39, %v670_v60 }
 0x324   : > { %v672_v62 = vmul.f32 1.442695, %v671_v61 }
 0x326   : > { %1606 = vpow2.f32 %v672_v62 }
 0x32f   : > { %916 = vrot.lane.b32.xlu0 %v1356_v57, %s1902_s12 }
 0x330   : > { %v1607_v63 = vpop.eup %1606 }
 0x331   : > { %v677_v1 = vpack.c.bf16 %v1607_v63, %v1607_v63  ;;  %v674_v17 = vsel %vm621_vm3, %v1607_v63, 0.0 }
 0x333   : > { %1436 = vmatmul.mubr.msk.bf16.vlgmr.msra.gmra.mrb[8].mxu0 %vm621_vm3, %v677_v1 }
 0x334   : > { %1447 = vmatprep.mubr.msk.bf16.mxu0 %vm1901_vm0, %v1900_v0 }
 0x396   : > { %v786_v2 = vpop.xlane.xlu1 %785 }
 0x397   : > { %v787_v3 = vsub.f32 %v778_v44, %v786_v2 }
 0x399   : > { %v788_v4 = vmul.f32 1.442695, %v787_v3 }
 0x39a   : > { %v798_v5 = vpop.permute.xlu1 %797 }
 0x39b   : > { %1608 = vpow2.f32 %v788_v4  ;;  %v803_v6 = vsel %vm681_vm4, %v798_v5, 0 }
 0x39c   : > { %1446 = vmatpush3.bf16.msra.mxu0 %v803_v6 }
 0x39d   : > { %1457 = vmatprep.subr.bf16.mxu0 %v1900_v0 }
 0x39e   : > { %v908_v7 = vpop.xlane.xlu0 %907  ;;  %v1036_v20 = vpop.permute.xlu1 %1035 }
 0x39f   : > { %v909_v8 = vsub.f32 %v900_v49, %v908_v7  ;;  %v1041_v23 = vsel %vm681_vm4, %v1036_v20, 0 }
 0x3a1   : > { %v910_v9 = vmul.f32 1.442695, %v909_v8 }
 0x3a3   : > { %1610 = vpow2.f32 %v910_v9 }
 0x3a5   : > { %v1609_v10 = vpop.eup %1608 }
 0x3a6   : > { %v1027_v11 = vpop.xlane.xlu0 %1026  ;;  %v790_v12 = vsel %vm621_vm3, %v1609_v10, 0.0  ;;  %v793_v13 = vpack.c.bf16 %v1609_v10, %v1609_v10 }
 0x3a7   : > { %v1028_v14 = vsub.f32 %v1019_v54, %v1027_v11  ;;  %791 = vadd.xlane.f32.xlu1 %v790_v12 }
 0x3a8   : > { %1448 = vmatmul.mubr.msk.bf16.vlgmr.msra.gmra.mrb[12].mxu0 %vm621_vm3, %v793_v13 }
 0x3a9   : > { %v1029_v15 = vmul.f32 1.442695, %v1028_v14  ;;  %1459 = vmatprep.mubr.msk.bf16.mxu0 %vm1901_vm0, %v1900_v0 }
 0x3aa   : > { %v917_v16 = vpop.permute.xlu0 %916 }
 0x3ab   : > { %1612 = vpow2.f32 %v1029_v15  ;;  %v922_v18 = vsel %vm681_vm4, %v917_v16, 0  ;;  %675 = vadd.xlane.f32.xlu1 %v674_v17 }
 0x3ac   : > { %1458 = vmatpush3.bf16.msra.mxu0 %v922_v18 }
 0x3ad   : > { %v1611_v19 = vpop.eup %1610  ;;  %1469 = vmatprep.subr.bf16.mxu0 %v1900_v0 }
 0x3ae   : > { %v912_v21 = vsel %vm621_vm3, %v1611_v19, 0.0  ;;  %v915_v22 = vpack.c.bf16 %v1611_v19, %v1611_v19 }
 0x3af   : > { %913 = vadd.xlane.f32.xlu0 %v912_v21 }
 0x3b0   : > { %1460 = vmatmul.mubr.msk.bf16.vlgmr.msra.gmra.mrb[16].mxu0 %vm621_vm3, %v915_v22 }
 0x3b1   : > { %1470 = vmatpush3.bf16.msra.mxu0 %v1041_v23  ;;  %1471 = vmatprep.mubr.msk.bf16.mxu0 %vm1901_vm0, %v1900_v0 }
 0x3b5   : > { %v1613_v24 = vpop.eup %1612 }
 0x3b6   : > { %v1031_v25 = vsel %vm621_vm3, %v1613_v24, 0.0  ;;  %v1034_v26 = vpack.c.bf16 %v1613_v24, %v1613_v24 }
 0x3b7   : > { %1032 = vadd.xlane.f32.xlu0 %v1031_v25 }
 0x3b8   : > { %1472 = vmatmul.mubr.msk.bf16.vlgmr.msra.gmra.mrb[20].mxu0 %vm621_vm3, %v1034_v26 }
 0x406   : > { %v719_v27 = vpop.f32.mrb[8].mxu0 }
 0x407   : > { %v1437_v28 = vpop.f32.mrb[9].mxu0 }
 0x408   : > { %v722_v29 = vpop.f32.mrb[10].mxu0 }
 0x409   : > { %v1438_v30 = vpop.f32.mrb[11].mxu0 }
 0x434   : > { %v792_v31 = vpop.xlane.xlu1 %791 }
 0x438   : > { %v676_v32 = vpop.xlane.xlu1 %675 }
 0x439   : > { %1614 = vrcp.f32 %v676_v32 }
 0x43a   : > { %1616 = vrcp.f32 %v792_v31 }
 0x43c   : > { %v914_v36 = vpop.xlane.xlu0 %913 }
 0x43d   : > { %1618 = vrcp.f32 %v914_v36 }
 0x443   : > { %v1615_v33 = vpop.eup %1614 }
 0x444   : > { %v726_v34 = vmul.f32 %v1615_v33, %v719_v27  ;;  %v1617_v37 = vpop.eup %1616  ;;  %v1033_v42 = vpop.xlane.xlu0 %1032 }
 0x445   : > { %1620 = vrcp.f32 %v1033_v42 }
 0x446   : > { %v727_v35 = vpack.c.bf16 %v726_v34, %v726_v34 }
 0x447   : > { %v1619_v45 = vpop.eup %1618 }
 0x448   : > { %729 = vst.msk [vmem:[#allocation4] sm:$0xf] %vm728_vm5, %v727_v35 }
 0x44f   : > { %v1621_v54 = vpop.eup %1620 }
 0x47b   : > { %v839_v38 = vpop.f32.mrb[12].mxu0 }
 0x47c   : > { %v846_v39 = vmul.f32 %v1617_v37, %v839_v38  ;;  %v1449_v40 = vpop.f32.mrb[13].mxu0 }
 0x47d   : > { %v842_v41 = vpop.f32.mrb[14].mxu0 }
 0x47e   : > { %v1372_v43 = vpack.c.bf16 %v846_v39, %v846_v39  ;;  %v1450_v44 = vpop.f32.mrb[15].mxu0 }
 0x480   : > { %851 = vrot.lane.b32.xlu0 %v1372_v43, %s1905_s19 }
 0x483   : > { %v958_v46 = vpop.f32.mrb[16].mxu0 }
 0x484   : > { %v965_v48 = vmul.f32 %v1619_v45, %v958_v46  ;;  %v1461_v49 = vpop.f32.mrb[17].mxu0 }
 0x485   : > { %v961_v50 = vpop.f32.mrb[18].mxu0 }
 0x486   : > { %v1373_v52 = vpack.c.bf16 %v965_v48, %v965_v48  ;;  %v1462_v53 = vpop.f32.mrb[19].mxu0 }
 0x488   : > { %970 = vrot.lane.b32.xlu1 %v1373_v52, %s1906_s23 }
 0x48b   : > { %v1077_v55 = vpop.f32.mrb[20].mxu0 }
 0x48c   : > { %v1084_v56 = vmul.f32 %v1621_v54, %v1077_v55  ;;  %v1473_v57 = vpop.f32.mrb[21].mxu0 }
 0x48d   : > { %v1080_v58 = vpop.f32.mrb[22].mxu0 }
 0x48e   : > { %v1374_v59 = vpack.c.bf16 %v1084_v56, %v1084_v56  ;;  %v1474_v60 = vpop.f32.mrb[23].mxu0 }
 0x490   : > { %1089 = vrot.lane.b32.xlu1 %v1374_v59, %s1907_s29 }
 0x4f2   : > { %v852_v61 = vpop.permute.xlu0 %851 }
 0x4f3   : > { %855 = vst.msk [vmem:[#allocation4] sm:$0xf] %vm854_vm6, %v852_v61 }
 0x4fa   : > { %v971_v62 = vpop.permute.xlu1 %970 }
 0x4fb   : > { %974 = vst.msk [vmem:[#allocation4] sm:$0xf] %vm973_vm7, %v971_v62 }
 0x502   : > { %v1090_v0 = vpop.permute.xlu1 %1089 }
 0x503   : > { %1093 = vst.msk [vmem:[#allocation4] sm:$0xf] %vm1092_vm8, %v1090_v0 }
 0x50a   : > { %v1094_v63 = vld [vmem:[#allocation4] sm:$0xf] }
 0x50b   : > { %1480 = vmatmul.mubr.msk.bf16.vlgmr.msra.gmra.mrb[20].mxu1 %vm448_vm1, %v1094_v63 }
 0x5de   : > { %v1148_v1 = vpop.f32.mrb[20].mxu1 }
 0x5df   : > { %1154 = vst.msk [vmem:[%s425_s24] sm:$0xff] %vm448_vm1, %v1148_v1  ;;  %v1481_v2 = vpop.f32.mrb[21].mxu1 }
 0x5e0   : > { %v1151_v3 = vpop.f32.mrb[22].mxu1 }
 0x5e1   : > { %1809 = shalt.err (!%p1806_p12)
}
 0x5e2   : > { %s1810_s3 = scalar_lea.hbm %s2329_s11, 128  ;;  %s1814_s12 = scalar_lea.hbm %s2451_s21, 256 }
 0x5e3   : > { %p1811_p8 = scmp.ne.s32.totalorder %s2329_s11, %s1810_s3  ;;  %p1815_p5 = scmp.lt.u32.totalorder %s2329_s11, %s2451_s21 }
 0x5e4   : > { %p1816_p9 = scmp.lt.u32.totalorder %s1814_s12, %s1810_s3  ;;  %p1818_p4 = scmp.lt.u32.totalorder %s1810_s3, %s2329_s11 }
 0x5e5   : > { %p1812_p11 = pnand %p1811_p8, %p2452_p7 }
 0x5e6   : > { %p1817_p2 = por %p1816_p9, %p1815_p5 }
 0x5e7   : > { %p1813_p10 = pneg %p1812_p11 }
 0x5e8   : > { %p1819_p3 = por %p1818_p4, %p1817_p2 }
 0x5ea   : > { %p1820_p1 = pnand %p1819_p3, %p1813_p10 }
 0x5ec   : > { %1823 = shalt.err (!%p1820_p1)
}
 0x5ed   : > { %1501 = dma.vmem_to_hbm [thread:$0]  (%p2452_p7), %s2331_s28, 128, %s2329_s11, %s1156_s17   ;;  %v1482_v4 = vpop.f32.mrb[23].mxu1 }
 0x5ee PF: > { %s2453_s19 = sld [smem:[#allocation22_spill]]  ;;  %s2454_s23 = sld [smem:[#allocation26_spill]] }
 0x5ef   : > { %s2455_s22 = sld [smem:[#allocation25_spill]] }
 0x5f4   : > { %s1182_s29 = sand.u32 1, %s2453_s19   ;;  %p2456_p13 = scmp.ne.s32.totalorder %s2454_s23, 0 }
 0x5f5   : > { %p2457_p6 = scmp.ge.s32.totalorder %s2455_s22, 2  ;;  %s1183_s13 = scalar_lea.sflag [#allocation7], %s1182_s29 }
 0x5f7   : > { %p1524_p0 = pnand %p2457_p6, %p2456_p13 }
 0x5f9   : > { %1865 = dma.done.wait (!%p1524_p0), %s1183_s13, 128  }
 0x5fa   : > { %1867 = vsyncadd (!%p1524_p0), %s1183_s13, 4294967168  ;;  %s28_s29 = sadd.s32 1, %s2455_s22   ;;  %s2458_s16 = sld [smem:[#allocation29_spill]] }
 0x5fb   : > { %p25_p12 = scmp.ge.s32.totalorder %s28_s29, 4   ;;  %s2459_s27 = sld [smem:[#allocation24_spill]] }
 0x5fc   : > { %s2460_s28 = sld [smem:[#allocation27_spill]]  ;;  %s2461_s24 = smov %s1874_s25 }
 0x5fd   : > { %s2462_s25 = smov %s1878_s26  ;;  %27 = sbr.rel (!%p25_p12) target bundleno = 14 (0xe), region = 133 }
 0x600   : > { %s2463_s26 = smov %s2458_s16 }
 0x604   :  { %1188 = vsyncpa [#allocation6], 1 }
 0x605   :  { %1190 = vsyncpa [#allocation6 + $0x1], 1 }
 0x606   :  { %1191 = vsyncpa [#allocation9], 1 }
 0x607   :  { %1193 = vsyncpa [#allocation9 + $0x1], 1 }
 0x608   :  { %1194 = vsyncpa [#allocation12], 1 }
 0x609   :  { %1195 = vsyncpa [#allocation15], 1 }
 0x60a   :  { %1196 = vsyncpa [#allocation7], 1 }
 0x60b   :  { %1198 = vsyncpa [#allocation7 + $0x1], 1 }

</bundles_post_ra>
